<compile_context>
chip_gen: v7x
topology: tpu7x:2x2x1
jax: 0.10.0
libtpu: 0.0.40
codegen_flags: <defaults>
</compile_context>

<pallas_src>
import jax
import jax.numpy as jnp
from jax import lax
from jax.experimental import pallas as pl
from jax.experimental.pallas import tpu as pltpu


def new_basicblock_kernel(x_ref, w1_ref, b1_ref, w2_ref, b2_ref,
                          w3_ref, b3_ref, out_ref):
    # x_ref block: (Nb, H, W*Cin), lane-dense, in the matmul dtype (bf16).
    Nb, H, WC = x_ref.shape
    WP = w1_ref.shape[1]            # W * planes
    WCout = w3_ref.shape[1]         # W * expansion*planes (== WC, no downsample)
    R = Nb * H                      # matmul rows, ordered (n, h)
    mm_dtype = x_ref.dtype

    x2d = x_ref[...].reshape(R, WC)                       # free (major dims only)

    # ---- conv1 (1x1, block-diagonal over w) + bn1 (folded) + relu ----
    h1 = jnp.dot(x2d, w1_ref[...], preferred_element_type=jnp.float32)
    h1 = jnp.maximum(h1 + b1_ref[...], 0.0)               # (R, W*P) f32

    # ---- conv2 (3x3, stride 1, pad 1) + index_select + bn2 (folded) + relu.
    # dx taps and x zero-padding are baked into the banded weights w2_ref[dy];
    # dy taps are per-image H shifts (zero row at the image top/bottom).
    # Three MXU matmuls accumulated in f32; no im2col scratch, no round trip. ----
    h1b = h1.reshape(Nb, H, WP)                            # f32, free reshape
    zrow = jnp.zeros((Nb, 1, WP), jnp.float32)
    up = jnp.concatenate([zrow, h1b[:, :H - 1, :]], axis=1)    # input row oh-1
    down = jnp.concatenate([h1b[:, 1:, :], zrow], axis=1)      # input row oh+1
    acc = jnp.dot(up.reshape(R, WP).astype(mm_dtype), w2_ref[0],
                  preferred_element_type=jnp.float32)
    acc += jnp.dot(h1b.reshape(R, WP).astype(mm_dtype), w2_ref[1],
                   preferred_element_type=jnp.float32)
    acc += jnp.dot(down.reshape(R, WP).astype(mm_dtype), w2_ref[2],
                   preferred_element_type=jnp.float32)
    h2 = jnp.maximum(acc + b2_ref[...], 0.0)               # (R, W*P) f32

    # ---- conv3 (1x1, block-diagonal over w) + bn3 (folded) ----
    h3 = jnp.dot(h2.astype(mm_dtype), w3_ref[...],
                 preferred_element_type=jnp.float32) + b3_ref[...]

    # ---- residual add (downsample is None for this config) + relu ----
    out = jnp.maximum(h3 + x2d.astype(jnp.float32), 0.0)   # (R, W*Cout) f32
    out_ref[...] = out.reshape(Nb, H, WCout).astype(out_ref.dtype)


def new_basicblock(x_nhwc, params, *, images_per_block=None,
                   matmul_dtype=jnp.bfloat16, out_dtype=jnp.bfloat16):
    """Fused NewBasicblock forward (identity-residual path).

    `params` = (w1f, b1, w2f, b2, w3f, b3) with the BN (eval) scales and the
    index_select already folded into the conv weights (see __main__).
    Returns NHWC (the lane-dense HBM slab is reshaped host-side, free).
    """
    w1f, b1, w2f, b2, w3f, b3 = params
    N, H, W, Cin = x_nhwc.shape
    P = w1f.shape[1]
    Cout = w3f.shape[1]
    if Cin != Cout:
        # TODO(synk): downsample branch (stride != 1 or in_planes != 4*planes)
        # is not implemented.
        raise NotImplementedError("downsample path not implemented")
    WC, WP, WCout = W * Cin, W * P, W * Cout

    # ---- host-side packing into the lane-dense layout --------------------
    # 1x1 convs -> block-diagonal (over w) matmuls; 3x3 conv -> one banded
    # matmul per dy tap (the dx offsets and the spatial zero-padding in x are
    # encoded by the band structure).  Built in f32, cast to bf16 once, so the
    # rounding matches element-wise folding of the original weights.
    eye_w = jnp.eye(W, dtype=jnp.float32)
    w1c = jnp.kron(eye_w, w1f.astype(jnp.float32)).astype(matmul_dtype)
    w3c = jnp.kron(eye_w, w3f.astype(jnp.float32)).astype(matmul_dtype)
    w2c = jnp.stack([
        sum(jnp.kron(jnp.eye(W, k=1 - dx, dtype=jnp.float32),
                     w2f[dy, dx].astype(jnp.float32))
            for dx in range(3))
        for dy in range(3)]).astype(matmul_dtype)           # (3, W*P, W*P)
    b1t = jnp.tile(b1.astype(jnp.float32), (1, W))          # (1, W*P)
    b2t = jnp.tile(b2.astype(jnp.float32), (1, W))          # (1, W*P)
    b3t = jnp.tile(b3.astype(jnp.float32), (1, W))          # (1, W*Cout)

    x_in = x_nhwc.reshape(N, H, WC).astype(matmul_dtype)

    # ---- block-size heuristic (generation aware, VMEM gated) --------------
    LANE, SUB = 128, 8
    def _pad2(r, c):
        return (-(-r // SUB) * SUB) * (-(-c // LANE) * LANE)
    in_item = jnp.dtype(matmul_dtype).itemsize
    out_item = jnp.dtype(out_dtype).itemsize
    weight_bytes = ((_pad2(WC, WP) + 3 * _pad2(WP, WP) + _pad2(WP, WCout))
                    * in_item
                    + (2 * _pad2(1, WP) + _pad2(1, WCout)) * 4)
    VMEM_BUDGET = 24 * 1024 * 1024     # conservative: fits under v7x's 64 MiB
    VMEM_LIMIT = 32 * 1024 * 1024

    def block_vmem_bytes(nb):
        # double-buffered in/out blocks + (worst case double-buffered) weights
        return (2 * nb * _pad2(H, WC) * in_item
                + 2 * nb * _pad2(H, WCout) * out_item
                + 2 * weight_bytes)

    if images_per_block is None:
        try:
            kind = jax.devices()[0].device_kind.lower()
        except Exception:
            kind = ""
        # >=256 pixel rows/step on v6e/v7x (2x256^2 MXU, per-step overhead);
        # ~128 already suffices on v5e (4x128^2 MXU, store-path bound).
        rows_target = 128 if "v5" in kind else 256
        images_per_block = 1
        for nb in range(1, N + 1):
            if N % nb:
                continue
            if N >= 2 and N // nb < 2:
                continue   # keep >=2 grid steps so both v7x TensorCores get work
            if block_vmem_bytes(nb) > VMEM_BUDGET:
                break
            images_per_block = nb
            if nb * H * W >= rows_target:
                break
    Nb = images_per_block
    assert N % Nb == 0

    # ---- pallas_call -------------------------------------------------------
    def const_spec(a, pmode):
        # Constant index_map -> block stays VMEM-resident across the grid.
        nd = a.ndim
        if pmode is None:
            return pl.BlockSpec(a.shape, lambda n, _nd=nd: (0,) * _nd)
        return pl.BlockSpec(a.shape, lambda n, _nd=nd: (0,) * _nd,
                            pipeline_mode=pmode)

    def build(weight_pmode):
        grid_spec = pltpu.PrefetchScalarGridSpec(
            num_scalar_prefetch=0,
            grid=(N // Nb,),
            in_specs=[
                pl.BlockSpec((Nb, H, WC), lambda n: (n, 0, 0)),
                const_spec(w1c, weight_pmode), const_spec(b1t, weight_pmode),
                const_spec(w2c, weight_pmode), const_spec(b2t, weight_pmode),
                const_spec(w3c, weight_pmode), const_spec(b3t, weight_pmode),
            ],
            out_specs=pl.BlockSpec((Nb, H, WCout), lambda n: (n, 0, 0)),
        )
        return pl.pallas_call(
            new_basicblock_kernel,
            out_shape=jax.ShapeDtypeStruct((N, H, WCout), out_dtype),
            grid_spec=grid_spec,
            compiler_params=pltpu.CompilerParams(
                dimension_semantics=("parallel",),
                vmem_limit_bytes=VMEM_LIMIT),
        )

    args = (x_in, w1c, b1t, w2c, b2t, w3c, b3t)
    try:
        # Never-changing weight/bias blocks don't need double-buffering.
        out = build(pl.Buffered(1))(*args)
    except Exception:
        out = build(None)(*args)    # fall back to default buffering
    # Lane-dense (N, H, W*Cout) HBM slab -> NHWC view (contiguous, free).
    return out.reshape(N, H, W, Cout)


def fold_bn(gamma, beta, mean, var, eps=1e-5):
    scale = gamma / jnp.sqrt(var + eps)
    bias = beta - mean * scale
    return scale[None, :], bias[None, :]        # (1, C)


def reference_module(x, w1, s1, b1, w2, idx, s2, b2, w3, s3, b3):
    """Pure-JAX, f32, unfused mirror of the PyTorch forward (NHWC)."""
    hp = lax.Precision.HIGHEST
    h = jnp.einsum('nhwc,cp->nhwp', x, w1, precision=hp)
    h = jax.nn.relu(h * s1[0] + b1[0])
    h2 = lax.conv_general_dilated(h, w2, (1, 1), 'SAME',
                                  dimension_numbers=('NHWC', 'HWIO', 'NHWC'),
                                  precision=hp)
    h2 = jnp.take(h2, idx, axis=-1)             # torch.index_select(dim=1)
    h2 = jax.nn.relu(h2 * s2[0] + b2[0])
    h3 = jnp.einsum('nhwp,pq->nhwq', h2, w3, precision=hp)
    h3 = h3 * s3[0] + b3[0]
    return jax.nn.relu(h3 + x)                  # residual = x (no downsample)


def reference_folded(x, w1f, b1, w2f, b2, w3f, b3, matmul_dtype):
    """Mirror of the kernel's numerics (bf16 matmul operands, f32 math)."""
    hp = lax.Precision.HIGHEST
    rnd = lambda a: a.astype(matmul_dtype).astype(jnp.float32)
    xr = rnd(x)
    h1 = jax.nn.relu(jnp.einsum('nhwc,cp->nhwp', xr, rnd(w1f), precision=hp)
                     + b1[0])
    h2 = lax.conv_general_dilated(rnd(h1), rnd(w2f), (1, 1), 'SAME',
                                  dimension_numbers=('NHWC', 'HWIO', 'NHWC'),
                                  precision=hp)
    h2 = jax.nn.relu(h2 + b2[0])
    h3 = jnp.einsum('nhwp,pq->nhwq', rnd(h2), rnd(w3f), precision=hp) + b3[0]
    return jax.nn.relu(h3 + xr)


if __name__ == "__main__":
    N, H, W = 4, 8, 8
    planes = 4
    expansion = 4
    in_planes = expansion * planes              # 16 -> downsample is None
    conv2_out = 6                               # pruned conv2 raw channel count
    out_list0 = jnp.array([0, 2, 3, 5], dtype=jnp.int32)   # out_list[0]

    key = jax.random.PRNGKey(0)
    ks = jax.random.split(key, 16)

    # NHWC input (equivalent NCHW shape: (4, 16, 8, 8))
    x = jax.random.normal(ks[0], (N, H, W, in_planes), jnp.float32)

    w1 = 0.1 * jax.random.normal(ks[1], (in_planes, planes), jnp.float32)
    w2 = 0.1 * jax.random.normal(ks[2], (3, 3, planes, conv2_out), jnp.float32)
    w3 = 0.1 * jax.random.normal(ks[3], (planes, expansion * planes), jnp.float32)

    def bn_params(kg, kb, km, kv, c):
        gamma = 1.0 + 0.1 * jax.random.normal(kg, (c,), jnp.float32)
        beta = 0.1 * jax.random.normal(kb, (c,), jnp.float32)
        mean = 0.1 * jax.random.normal(km, (c,), jnp.float32)
        var = jax.random.uniform(kv, (c,), jnp.float32, minval=0.5, maxval=1.5)
        return gamma, beta, mean, var

    s1, b1 = fold_bn(*bn_params(ks[4], ks[5], ks[6], ks[7], planes))
    s2, b2 = fold_bn(*bn_params(ks[8], ks[9], ks[10], ks[11], planes))
    s3, b3 = fold_bn(*bn_params(ks[12], ks[13], ks[14], ks[15],
                                expansion * planes))

    # Host-side (exact) folding:
    #   torch.index_select(conv2(x), 1, idx)  ==  conv with  w2[..., idx]
    #   BN (eval) scale folds into the conv weight columns; bias stays separate.
    w1f = w1 * s1[0]
    w2f = w2[:, :, :, out_list0] * s2[0]
    w3f = w3 * s3[0]

    out = new_basicblock(x, (w1f, b1, w2f, b2, w3f, b3))
    out = jax.block_until_ready(out)
    assert out.shape == (N, H, W, expansion * planes)
    out_f32 = out.astype(jnp.float32)

    # Tight check vs. a pure-JAX mirror of the kernel's numerics (the only
    # extra divergence is the bf16 output rounding).
    ref_tight = reference_folded(x, w1f, b1, w2f, b2, w3f, b3, jnp.bfloat16)
    assert jnp.allclose(out_f32, ref_tight, atol=2e-2, rtol=2e-2), \
        "mismatch vs folded reference"

    # Loose check vs. the original (unfused, f32) module semantics.
    ref_mod = reference_module(x, w1, s1, b1, w2, out_list0, s2, b2, w3, s3, b3)
    assert jnp.allclose(out_f32, ref_mod, atol=7e-2, rtol=7e-2), \
        "mismatch vs module reference"

    print("KERNEL_OK")
</pallas_src>

<mosaic_0001>
module attributes {stable_mosaic.version = 11 : i64} {
  func.func @new_basicblock_kernel(%arg0: i32, %arg1: memref<2x8x128xbf16, #tpu.memory_space<vmem>>, %arg2: memref<128x32xbf16, #tpu.memory_space<vmem>>, %arg3: memref<1x32xf32, #tpu.memory_space<vmem>>, %arg4: memref<3x32x32xbf16, #tpu.memory_space<vmem>>, %arg5: memref<1x32xf32, #tpu.memory_space<vmem>>, %arg6: memref<32x128xbf16, #tpu.memory_space<vmem>>, %arg7: memref<1x128xf32, #tpu.memory_space<vmem>>, %arg8: memref<2x8x128xbf16, #tpu.memory_space<vmem>>) attributes {dimension_semantics = [#tpu.dimension_semantics<parallel>], iteration_bounds = array<i64: 2>, scalar_prefetch = 0 : i64, scratch_operands = 0 : i64, tpu.core_type = #tpu.core_type<tc>, window_params = [{transform_indices = @transform_0, window_bounds = array<i64: 2, 8, 128>}, {pipeline_mode = #tpu.pipeline_mode<synchronous>, transform_indices = @transform_1, window_bounds = array<i64: 128, 32>}, {pipeline_mode = #tpu.pipeline_mode<synchronous>, transform_indices = @transform_2, window_bounds = array<i64: 1, 32>}, {pipeline_mode = #tpu.pipeline_mode<synchronous>, transform_indices = @transform_3, window_bounds = array<i64: 3, 32, 32>}, {pipeline_mode = #tpu.pipeline_mode<synchronous>, transform_indices = @transform_4, window_bounds = array<i64: 1, 32>}, {pipeline_mode = #tpu.pipeline_mode<synchronous>, transform_indices = @transform_5, window_bounds = array<i64: 32, 128>}, {pipeline_mode = #tpu.pipeline_mode<synchronous>, transform_indices = @transform_6, window_bounds = array<i64: 1, 128>}, {transform_indices = @transform_7, window_bounds = array<i64: 2, 8, 128>}]} {
    %c0 = arith.constant 0 : index
    %c0_0 = arith.constant 0 : index
    %c0_1 = arith.constant 0 : index
    %0 = vector.load %arg1[%c0, %c0_0, %c0_1] : memref<2x8x128xbf16, #tpu.memory_space<vmem>>, vector<2x8x128xbf16>
    %1 = vector.shape_cast %0 : vector<2x8x128xbf16> to vector<16x128xbf16>
    %c0_2 = arith.constant 0 : index
    %c0_3 = arith.constant 0 : index
    %2 = vector.load %arg2[%c0_2, %c0_3] : memref<128x32xbf16, #tpu.memory_space<vmem>>, vector<128x32xbf16>
    %cst = arith.constant dense<0.000000e+00> : vector<16x32xf32>
    %3 = tpu.matmul %1, %2, %cst {dimension_numbers = #tpu.dot_dimension_numbers<[1], [0], [0], [1], [0, 0, 1, 1], [], []>} : vector<16x128xbf16>, vector<128x32xbf16>, vector<16x32xf32> -> vector<16x32xf32>
    %c0_4 = arith.constant 0 : index
    %c0_5 = arith.constant 0 : index
    %4 = vector.load %arg3[%c0_4, %c0_5] : memref<1x32xf32, #tpu.memory_space<vmem>>, vector<1x32xf32>
    %5 = vector.broadcast %4 : vector<1x32xf32> to vector<16x32xf32>
    %6 = arith.addf %3, %5 : vector<16x32xf32>
    %cst_6 = arith.constant 0.000000e+00 : f32
    %7 = vector.broadcast %cst_6 : f32 to vector<16x32xf32>
    %8 = arith.maximumf %6, %7 : vector<16x32xf32>
    %9 = vector.shape_cast %8 : vector<16x32xf32> to vector<2x8x32xf32>
    %cst_7 = arith.constant 0.000000e+00 : f32
    %10 = vector.broadcast %cst_7 : f32 to vector<2x1x32xf32>
    %11 = vector.extract_strided_slice %9 {offsets = [0, 0, 0], sizes = [2, 7, 32], strides = [1, 1, 1]} : vector<2x8x32xf32> to vector<2x7x32xf32>
    %12 = tpu.concatenate %10, %11 in 1 : vector<2x1x32xf32>, vector<2x7x32xf32> -> vector<2x8x32xf32>
    %13 = vector.extract_strided_slice %9 {offsets = [0, 1, 0], sizes = [2, 7, 32], strides = [1, 1, 1]} : vector<2x8x32xf32> to vector<2x7x32xf32>
    %14 = tpu.concatenate %13, %10 in 1 : vector<2x7x32xf32>, vector<2x1x32xf32> -> vector<2x8x32xf32>
    %15 = vector.shape_cast %12 : vector<2x8x32xf32> to vector<16x32xf32>
    %16 = arith.truncf %15 : vector<16x32xf32> to vector<16x32xbf16>
    %c0_8 = arith.constant 0 : index
    %c0_9 = arith.constant 0 : index
    %c0_10 = arith.constant 0 : index
    %17 = vector.load %arg4[%c0_8, %c0_9, %c0_10] : memref<3x32x32xbf16, #tpu.memory_space<vmem>>, vector<1x32x32xbf16>
    %18 = vector.shape_cast %17 : vector<1x32x32xbf16> to vector<32x32xbf16>
    %cst_11 = arith.constant dense<0.000000e+00> : vector<16x32xf32>
    %19 = tpu.matmul %16, %18, %cst_11 {dimension_numbers = #tpu.dot_dimension_numbers<[1], [0], [0], [1], [0, 0, 1, 1], [], []>} : vector<16x32xbf16>, vector<32x32xbf16>, vector<16x32xf32> -> vector<16x32xf32>
    %20 = vector.shape_cast %9 : vector<2x8x32xf32> to vector<16x32xf32>
    %21 = arith.truncf %20 : vector<16x32xf32> to vector<16x32xbf16>
    %c1 = arith.constant 1 : index
    %c0_12 = arith.constant 0 : index
    %c0_13 = arith.constant 0 : index
    %22 = vector.load %arg4[%c1, %c0_12, %c0_13] : memref<3x32x32xbf16, #tpu.memory_space<vmem>>, vector<1x32x32xbf16>
    %23 = vector.shape_cast %22 : vector<1x32x32xbf16> to vector<32x32xbf16>
    %cst_14 = arith.constant dense<0.000000e+00> : vector<16x32xf32>
    %24 = tpu.matmul %21, %23, %cst_14 {dimension_numbers = #tpu.dot_dimension_numbers<[1], [0], [0], [1], [0, 0, 1, 1], [], []>} : vector<16x32xbf16>, vector<32x32xbf16>, vector<16x32xf32> -> vector<16x32xf32>
    %25 = arith.addf %19, %24 : vector<16x32xf32>
    %26 = vector.shape_cast %14 : vector<2x8x32xf32> to vector<16x32xf32>
    %27 = arith.truncf %26 : vector<16x32xf32> to vector<16x32xbf16>
    %c2 = arith.constant 2 : index
    %c0_15 = arith.constant 0 : index
    %c0_16 = arith.constant 0 : index
    %28 = vector.load %arg4[%c2, %c0_15, %c0_16] : memref<3x32x32xbf16, #tpu.memory_space<vmem>>, vector<1x32x32xbf16>
    %29 = vector.shape_cast %28 : vector<1x32x32xbf16> to vector<32x32xbf16>
    %cst_17 = arith.constant dense<0.000000e+00> : vector<16x32xf32>
    %30 = tpu.matmul %27, %29, %cst_17 {dimension_numbers = #tpu.dot_dimension_numbers<[1], [0], [0], [1], [0, 0, 1, 1], [], []>} : vector<16x32xbf16>, vector<32x32xbf16>, vector<16x32xf32> -> vector<16x32xf32>
    %31 = arith.addf %25, %30 : vector<16x32xf32>
    %c0_18 = arith.constant 0 : index
    %c0_19 = arith.constant 0 : index
    %32 = vector.load %arg5[%c0_18, %c0_19] : memref<1x32xf32, #tpu.memory_space<vmem>>, vector<1x32xf32>
    %33 = vector.broadcast %32 : vector<1x32xf32> to vector<16x32xf32>
    %34 = arith.addf %31, %33 : vector<16x32xf32>
    %cst_20 = arith.constant 0.000000e+00 : f32
    %35 = vector.broadcast %cst_20 : f32 to vector<16x32xf32>
    %36 = arith.maximumf %34, %35 : vector<16x32xf32>
    %37 = arith.truncf %36 : vector<16x32xf32> to vector<16x32xbf16>
    %c0_21 = arith.constant 0 : index
    %c0_22 = arith.constant 0 : index
    %38 = vector.load %arg6[%c0_21, %c0_22] : memref<32x128xbf16, #tpu.memory_space<vmem>>, vector<32x128xbf16>
    %cst_23 = arith.constant dense<0.000000e+00> : vector<16x128xf32>
    %39 = tpu.matmul %37, %38, %cst_23 {dimension_numbers = #tpu.dot_dimension_numbers<[1], [0], [0], [1], [0, 0, 1, 1], [], []>} : vector<16x32xbf16>, vector<32x128xbf16>, vector<16x128xf32> -> vector<16x128xf32>
    %c0_24 = arith.constant 0 : index
    %c0_25 = arith.constant 0 : index
    %40 = vector.load %arg7[%c0_24, %c0_25] : memref<1x128xf32, #tpu.memory_space<vmem>>, vector<1x128xf32>
    %41 = vector.broadcast %40 : vector<1x128xf32> to vector<16x128xf32>
    %42 = arith.addf %39, %41 : vector<16x128xf32>
    %43 = arith.extf %1 : vector<16x128xbf16> to vector<16x128xf32>
    %44 = arith.addf %42, %43 : vector<16x128xf32>
    %cst_26 = arith.constant 0.000000e+00 : f32
    %45 = vector.broadcast %cst_26 : f32 to vector<16x128xf32>
    %46 = arith.maximumf %44, %45 : vector<16x128xf32>
    %47 = vector.shape_cast %46 : vector<16x128xf32> to vector<2x8x128xf32>
    %48 = arith.truncf %47 : vector<2x8x128xf32> to vector<2x8x128xbf16>
    %c0_27 = arith.constant 0 : index
    %c0_28 = arith.constant 0 : index
    %c0_29 = arith.constant 0 : index
    %49 = vector.load %arg8[%c0_27, %c0_28, %c0_29] : memref<2x8x128xbf16, #tpu.memory_space<vmem>>, vector<2x8x128xbf16>
    tpu.vector_store %arg8[%c0_27, %c0_28, %c0_29], %48 {strides = array<i32>} : memref<2x8x128xbf16, #tpu.memory_space<vmem>>, vector<2x8x128xbf16>,
    return
  }
  func.func @transform_0(%arg0: i32) -> (i32, i32, i32) {
    %c0_i32 = arith.constant 0 : i32
    %c0_i32_0 = arith.constant 0 : i32
    %c0_i32_1 = arith.constant 0 : i32
    return %arg0, %c0_i32, %c0_i32_0 : i32, i32, i32
  }
  func.func @transform_1(%arg0: i32) -> (i32, i32) {
    %c0_i32 = arith.constant 0 : i32
    %c0_i32_0 = arith.constant 0 : i32
    %c0_i32_1 = arith.constant 0 : i32
    return %c0_i32, %c0_i32_0 : i32, i32
  }
  func.func @transform_2(%arg0: i32) -> (i32, i32) {
    %c0_i32 = arith.constant 0 : i32
    %c0_i32_0 = arith.constant 0 : i32
    %c0_i32_1 = arith.constant 0 : i32
    return %c0_i32, %c0_i32_0 : i32, i32
  }
  func.func @transform_3(%arg0: i32) -> (i32, i32, i32) {
    %c0_i32 = arith.constant 0 : i32
    %c0_i32_0 = arith.constant 0 : i32
    %c0_i32_1 = arith.constant 0 : i32
    %c0_i32_2 = arith.constant 0 : i32
    return %c0_i32, %c0_i32_0, %c0_i32_1 : i32, i32, i32
  }
  func.func @transform_4(%arg0: i32) -> (i32, i32) {
    %c0_i32 = arith.constant 0 : i32
    %c0_i32_0 = arith.constant 0 : i32
    %c0_i32_1 = arith.constant 0 : i32
    return %c0_i32, %c0_i32_0 : i32, i32
  }
  func.func @transform_5(%arg0: i32) -> (i32, i32) {
    %c0_i32 = arith.constant 0 : i32
    %c0_i32_0 = arith.constant 0 : i32
    %c0_i32_1 = arith.constant 0 : i32
    return %c0_i32, %c0_i32_0 : i32, i32
  }
  func.func @transform_6(%arg0: i32) -> (i32, i32) {
    %c0_i32 = arith.constant 0 : i32
    %c0_i32_0 = arith.constant 0 : i32
    %c0_i32_1 = arith.constant 0 : i32
    return %c0_i32, %c0_i32_0 : i32, i32
  }
  func.func @transform_7(%arg0: i32) -> (i32, i32, i32) {
    %c0_i32 = arith.constant 0 : i32
    %c0_i32_0 = arith.constant 0 : i32
    %c0_i32_1 = arith.constant 0 : i32
    return %arg0, %c0_i32, %c0_i32_0 : i32, i32, i32
  }
}

module attributes {stable_mosaic.version = 11 : i64} {
  func.func @new_basicblock_kernel(%arg0: i32, %arg1: memref<2x8x128xbf16, #tpu.memory_space<vmem>>, %arg2: memref<128x32xbf16, #tpu.memory_space<vmem>>, %arg3: memref<1x32xf32, #tpu.memory_space<vmem>>, %arg4: memref<3x32x32xbf16, #tpu.memory_space<vmem>>, %arg5: memref<1x32xf32, #tpu.memory_space<vmem>>, %arg6: memref<32x128xbf16, #tpu.memory_space<vmem>>, %arg7: memref<1x128xf32, #tpu.memory_space<vmem>>, %arg8: memref<2x8x128xbf16, #tpu.memory_space<vmem>>) attributes {dimension_semantics = [#tpu.dimension_semantics<parallel>], iteration_bounds = array<i64: 2>, scalar_prefetch = 0 : i64, scratch_operands = 0 : i64, tpu.core_type = #tpu.core_type<tc>, window_params = [{transform_indices = @transform_0, window_bounds = array<i64: 2, 8, 128>}, {pipeline_mode = #tpu.pipeline_mode<synchronous>, transform_indices = @transform_1, window_bounds = array<i64: 128, 32>}, {pipeline_mode = #tpu.pipeline_mode<synchronous>, transform_indices = @transform_2, window_bounds = array<i64: 1, 32>}, {pipeline_mode = #tpu.pipeline_mode<synchronous>, transform_indices = @transform_3, window_bounds = array<i64: 3, 32, 32>}, {pipeline_mode = #tpu.pipeline_mode<synchronous>, transform_indices = @transform_4, window_bounds = array<i64: 1, 32>}, {pipeline_mode = #tpu.pipeline_mode<synchronous>, transform_indices = @transform_5, window_bounds = array<i64: 32, 128>}, {pipeline_mode = #tpu.pipeline_mode<synchronous>, transform_indices = @transform_6, window_bounds = array<i64: 1, 128>}, {transform_indices = @transform_7, window_bounds = array<i64: 2, 8, 128>}]} {
    %c0 = arith.constant 0 : index
    %c0_0 = arith.constant 0 : index
    %c0_1 = arith.constant 0 : index
    %0 = vector.load %arg1[%c0, %c0_0, %c0_1] : memref<2x8x128xbf16, #tpu.memory_space<vmem>>, vector<2x8x128xbf16>
    %1 = vector.shape_cast %0 : vector<2x8x128xbf16> to vector<16x128xbf16>
    %c0_2 = arith.constant 0 : index
    %c0_3 = arith.constant 0 : index
    %2 = vector.load %arg2[%c0_2, %c0_3] : memref<128x32xbf16, #tpu.memory_space<vmem>>, vector<128x32xbf16>
    %cst = arith.constant dense<0.000000e+00> : vector<16x32xf32>
    %3 = tpu.matmul %1, %2, %cst {dimension_numbers = #tpu.dot_dimension_numbers<[1], [0], [0], [1], [0, 0, 1, 1], [], []>} : vector<16x128xbf16>, vector<128x32xbf16>, vector<16x32xf32> -> vector<16x32xf32>
    %c0_4 = arith.constant 0 : index
    %c0_5 = arith.constant 0 : index
    %4 = vector.load %arg3[%c0_4, %c0_5] : memref<1x32xf32, #tpu.memory_space<vmem>>, vector<1x32xf32>
    %5 = vector.broadcast %4 : vector<1x32xf32> to vector<16x32xf32>
    %6 = arith.addf %3, %5 : vector<16x32xf32>
    %cst_6 = arith.constant 0.000000e+00 : f32
    %7 = vector.broadcast %cst_6 : f32 to vector<16x32xf32>
    %8 = arith.maximumf %6, %7 : vector<16x32xf32>
    %9 = vector.shape_cast %8 : vector<16x32xf32> to vector<2x8x32xf32>
    %cst_7 = arith.constant 0.000000e+00 : f32
    %10 = vector.broadcast %cst_7 : f32 to vector<2x1x32xf32>
    %11 = vector.extract_strided_slice %9 {offsets = [0, 0, 0], sizes = [2, 7, 32], strides = [1, 1, 1]} : vector<2x8x32xf32> to vector<2x7x32xf32>
    %12 = tpu.concatenate %10, %11 in 1 : vector<2x1x32xf32>, vector<2x7x32xf32> -> vector<2x8x32xf32>
    %13 = vector.extract_strided_slice %9 {offsets = [0, 1, 0], sizes = [2, 7, 32], strides = [1, 1, 1]} : vector<2x8x32xf32> to vector<2x7x32xf32>
    %14 = tpu.concatenate %13, %10 in 1 : vector<2x7x32xf32>, vector<2x1x32xf32> -> vector<2x8x32xf32>
    %15 = vector.shape_cast %12 : vector<2x8x32xf32> to vector<16x32xf32>
    %16 = arith.truncf %15 : vector<16x32xf32> to vector<16x32xbf16>
    %c0_8 = arith.constant 0 : index
    %c0_9 = arith.constant 0 : index
    %c0_10 = arith.constant 0 : index
    %17 = vector.load %arg4[%c0_8, %c0_9, %c0_10] : memref<3x32x32xbf16, #tpu.memory_space<vmem>>, vector<1x32x32xbf16>
    %18 = vector.shape_cast %17 : vector<1x32x32xbf16> to vector<32x32xbf16>
    %cst_11 = arith.constant dense<0.000000e+00> : vector<16x32xf32>
    %19 = tpu.matmul %16, %18, %cst_11 {dimension_numbers = #tpu.dot_dimension_numbers<[1], [0], [0], [1], [0, 0, 1, 1], [], []>} : vector<16x32xbf16>, vector<32x32xbf16>, vector<16x32xf32> -> vector<16x32xf32>
    %20 = vector.shape_cast %9 : vector<2x8x32xf32> to vector<16x32xf32>
    %21 = arith.truncf %20 : vector<16x32xf32> to vector<16x32xbf16>
    %c1 = arith.constant 1 : index
    %c0_12 = arith.constant 0 : index
    %c0_13 = arith.constant 0 : index
    %22 = vector.load %arg4[%c1, %c0_12, %c0_13] : memref<3x32x32xbf16, #tpu.memory_space<vmem>>, vector<1x32x32xbf16>
    %23 = vector.shape_cast %22 : vector<1x32x32xbf16> to vector<32x32xbf16>
    %cst_14 = arith.constant dense<0.000000e+00> : vector<16x32xf32>
    %24 = tpu.matmul %21, %23, %cst_14 {dimension_numbers = #tpu.dot_dimension_numbers<[1], [0], [0], [1], [0, 0, 1, 1], [], []>} : vector<16x32xbf16>, vector<32x32xbf16>, vector<16x32xf32> -> vector<16x32xf32>
    %25 = arith.addf %19, %24 : vector<16x32xf32>
    %26 = vector.shape_cast %14 : vector<2x8x32xf32> to vector<16x32xf32>
    %27 = arith.truncf %26 : vector<16x32xf32> to vector<16x32xbf16>
    %c2 = arith.constant 2 : index
    %c0_15 = arith.constant 0 : index
    %c0_16 = arith.constant 0 : index
    %28 = vector.load %arg4[%c2, %c0_15, %c0_16] : memref<3x32x32xbf16, #tpu.memory_space<vmem>>, vector<1x32x32xbf16>
    %29 = vector.shape_cast %28 : vector<1x32x32xbf16> to vector<32x32xbf16>
    %cst_17 = arith.constant dense<0.000000e+00> : vector<16x32xf32>
    %30 = tpu.matmul %27, %29, %cst_17 {dimension_numbers = #tpu.dot_dimension_numbers<[1], [0], [0], [1], [0, 0, 1, 1], [], []>} : vector<16x32xbf16>, vector<32x32xbf16>, vector<16x32xf32> -> vector<16x32xf32>
    %31 = arith.addf %25, %30 : vector<16x32xf32>
    %c0_18 = arith.constant 0 : index
    %c0_19 = arith.constant 0 : index
    %32 = vector.load %arg5[%c0_18, %c0_19] : memref<1x32xf32, #tpu.memory_space<vmem>>, vector<1x32xf32>
    %33 = vector.broadcast %32 : vector<1x32xf32> to vector<16x32xf32>
    %34 = arith.addf %31, %33 : vector<16x32xf32>
    %cst_20 = arith.constant 0.000000e+00 : f32
    %35 = vector.broadcast %cst_20 : f32 to vector<16x32xf32>
    %36 = arith.maximumf %34, %35 : vector<16x32xf32>
    %37 = arith.truncf %36 : vector<16x32xf32> to vector<16x32xbf16>
    %c0_21 = arith.constant 0 : index
    %c0_22 = arith.constant 0 : index
    %38 = vector.load %arg6[%c0_21, %c0_22] : memref<32x128xbf16, #tpu.memory_space<vmem>>, vector<32x128xbf16>
    %cst_23 = arith.constant dense<0.000000e+00> : vector<16x128xf32>
    %39 = tpu.matmul %37, %38, %cst_23 {dimension_numbers = #tpu.dot_dimension_numbers<[1], [0], [0], [1], [0, 0, 1, 1], [], []>} : vector<16x32xbf16>, vector<32x128xbf16>, vector<16x128xf32> -> vector<16x128xf32>
    %c0_24 = arith.constant 0 : index
    %c0_25 = arith.constant 0 : index
    %40 = vector.load %arg7[%c0_24, %c0_25] : memref<1x128xf32, #tpu.memory_space<vmem>>, vector<1x128xf32>
    %41 = vector.broadcast %40 : vector<1x128xf32> to vector<16x128xf32>
    %42 = arith.addf %39, %41 : vector<16x128xf32>
    %43 = arith.extf %1 : vector<16x128xbf16> to vector<16x128xf32>
    %44 = arith.addf %42, %43 : vector<16x128xf32>
    %cst_26 = arith.constant 0.000000e+00 : f32
    %45 = vector.broadcast %cst_26 : f32 to vector<16x128xf32>
    %46 = arith.maximumf %44, %45 : vector<16x128xf32>
    %47 = vector.shape_cast %46 : vector<16x128xf32> to vector<2x8x128xf32>
    %48 = arith.truncf %47 : vector<2x8x128xf32> to vector<2x8x128xbf16>
    %c0_27 = arith.constant 0 : index
    %c0_28 = arith.constant 0 : index
    %c0_29 = arith.constant 0 : index
    %49 = vector.load %arg8[%c0_27, %c0_28, %c0_29] : memref<2x8x128xbf16, #tpu.memory_space<vmem>>, vector<2x8x128xbf16>
    tpu.vector_store %arg8[%c0_27, %c0_28, %c0_29], %48 {strides = array<i32>} : memref<2x8x128xbf16, #tpu.memory_space<vmem>>, vector<2x8x128xbf16>,
    return
  }
  func.func @transform_0(%arg0: i32) -> (i32, i32, i32) {
    %c0_i32 = arith.constant 0 : i32
    %c0_i32_0 = arith.constant 0 : i32
    %c0_i32_1 = arith.constant 0 : i32
    return %arg0, %c0_i32, %c0_i32_0 : i32, i32, i32
  }
  func.func @transform_1(%arg0: i32) -> (i32, i32) {
    %c0_i32 = arith.constant 0 : i32
    %c0_i32_0 = arith.constant 0 : i32
    %c0_i32_1 = arith.constant 0 : i32
    return %c0_i32, %c0_i32_0 : i32, i32
  }
  func.func @transform_2(%arg0: i32) -> (i32, i32) {
    %c0_i32 = arith.constant 0 : i32
    %c0_i32_0 = arith.constant 0 : i32
    %c0_i32_1 = arith.constant 0 : i32
    return %c0_i32, %c0_i32_0 : i32, i32
  }
  func.func @transform_3(%arg0: i32) -> (i32, i32, i32) {
    %c0_i32 = arith.constant 0 : i32
    %c0_i32_0 = arith.constant 0 : i32
    %c0_i32_1 = arith.constant 0 : i32
    %c0_i32_2 = arith.constant 0 : i32
    return %c0_i32, %c0_i32_0, %c0_i32_1 : i32, i32, i32
  }
  func.func @transform_4(%arg0: i32) -> (i32, i32) {
    %c0_i32 = arith.constant 0 : i32
    %c0_i32_0 = arith.constant 0 : i32
    %c0_i32_1 = arith.constant 0 : i32
    return %c0_i32, %c0_i32_0 : i32, i32
  }
  func.func @transform_5(%arg0: i32) -> (i32, i32) {
    %c0_i32 = arith.constant 0 : i32
    %c0_i32_0 = arith.constant 0 : i32
    %c0_i32_1 = arith.constant 0 : i32
    return %c0_i32, %c0_i32_0 : i32, i32
  }
  func.func @transform_6(%arg0: i32) -> (i32, i32) {
    %c0_i32 = arith.constant 0 : i32
    %c0_i32_0 = arith.constant 0 : i32
    %c0_i32_1 = arith.constant 0 : i32
    return %c0_i32, %c0_i32_0 : i32, i32
  }
  func.func @transform_7(%arg0: i32) -> (i32, i32, i32) {
    %c0_i32 = arith.constant 0 : i32
    %c0_i32_0 = arith.constant 0 : i32
    %c0_i32_1 = arith.constant 0 : i32
    return %arg0, %c0_i32, %c0_i32_0 : i32, i32, i32
  }
}

</mosaic_0001>

<bundles_post_ra>
// kernel: tpu_custom_call.1
= control target key start
LH: loop header
LB: loop body
LE: loop exit
PB: predicated region body
PF: predicated region fallthrough
CT: control target
= control target key end

     0   :  { %12 = vsyncpa [#allocation3], 0  ;;  %s1259_s0 = inlined_call_operand.vmem [shape: bf16[4,8,128], index: 0, kind: input, shape index: {}]   ;;  %s1260_s1 = inlined_call_operand.vmem [shape: bf16[128,32], index: 1, kind: input, shape index: {}]   ;;  %s1261_s2 = inlined_call_operand.vmem [shape: f32[1,32], index: 2, kind: input, shape index: {}]   ;;  %s1262_s3 = inlined_call_operand.vmem [shape: bf16[3,32,32], index: 3, kind: input, shape index: {}]   ;;  %s1263_s4 = inlined_call_operand.vmem [shape: f32[1,32], index: 4, kind: input, shape index: {}]   ;;  %s1264_s5 = inlined_call_operand.vmem [shape: bf16[32,128], index: 5, kind: input, shape index: {}]   ;;  %s1265_s6 = inlined_call_operand.vmem [shape: f32[1,128], index: 6, kind: input, shape index: {}]   ;;  %s1266_s7 = inlined_call_operand.hbm [shape: bf16[4,8,128], index: 7, kind: output, shape index: {}]  }
   0x1   :  { %14 = vsyncpa [#allocation3 + $0x1], 0  ;;  %s1065_s24 = smov 0   ;;  %s1067_s25 = smov 0  }
   0x2   :  { %s1069_s26 = smov 0   ;;  %s1071_s27 = smov 0  }
   0x3 LB: > { %s1086_s28 = sadd.s32 4294967295, %s1018_s27   ;;  %s772_s29 = sadd.s32 4294967294, %s1018_s27   ;;  %s1018_s27 = sphi %s1071_s27, %s1272_s27   ;;  %s1014_s26 = sphi %s1069_s26, %s1271_s26   ;;  %s1010_s25 = sphi %s1067_s25, %s1270_s25   ;;  %s1006_s24 = sphi %s1065_s24, %s1269_s24  }
   0x4   : > { %s1090_s30 = sadd.s32 1, %s1018_s27   ;;  %s179_s8 = sadd.s32 1, %s1014_s26 }
   0x5   : > { %s176_s9 = ssub.s32 %s1018_s27, %s1090_s30  ;;  %p189_p0 = scmp.ne.s32.totalorder %s1014_s26, %s1010_s25 }
   0x6   : > { %p177_p1 = scmp.eq.s32.totalorder %s176_s9, 0  ;;  %p190_p2 = scmp.eq.s32.totalorder %s1086_s28, 1 }
   0x7   : > { %p195_p3 = scmp.ne.s32.totalorder %s1010_s25, %s1006_s24  ;;  %p196_p4 = scmp.eq.s32.totalorder %s772_s29, 1 }
   0x8   : > { %s1101_s10 = scalar_select %p177_p1, %s1014_s26, %s179_s8  }
   0x9   : > { %p1103_p5 = por %p190_p2, %p189_p0  ;;  %p1107_p6 = por %p196_p4, %p195_p3 }
   0xa   : > { %p775_p7 = scmp.ge.s32.totalorder %s1018_s27, 1  ;;  %p241_p8 = scmp.lt.s32.totalorder %s1018_s27, 3 }
   0xc   : > { %p242_p9 = pnand %p775_p7, %p241_p8 }
   0xd   : > { %v938_v0 = vld [vmem:[%s1260_s1] sm:$0xff] (!%p242_p9)   ;;  %v1020_v1 = vmov (!%p242_p9), 0.0   ;;  %v939_v2 = vld [vmem:[%s1260_s1 + $0x8] sm:$0xff] (!%p242_p9)   ;;  %vm1021_vm0 = vmmov (!%p242_p9), 0   ;;  %v940_v3 = vld [vmem:[%s1260_s1 + $0x10] sm:$0xff] (!%p242_p9)   ;;  %s777_s19 = sshll.u32 (!%p242_p9), %s1086_s28, 1 }
   0xe   : > { %245 = sbr.rel (%p242_p9) target bundleno = 741 (0x2e5), region = 48  ;;  %843 = vmatprep.subr.bf16.mxu0 (!%p242_p9), %v1020_v1  ;;  %863 = vmatprep.subr.bf16.mxu1 (!%p242_p9), %v1020_v1  ;;  %v941_v4 = vld [vmem:[%s1260_s1 + $0x18] sm:$0xff] (!%p242_p9)   ;;  %p274_p10 = scmp.lt.s32.totalorder (!%p242_p9), %s777_s19, 3  ;;  %v942_v5 = vld [vmem:[%s1260_s1 + $0x20] sm:$0xff] (!%p242_p9)   ;;  %v943_v6 = vld [vmem:[%s1260_s1 + $0x28] sm:$0xff] (!%p242_p9)   ;;  %vm409_vm1 = vcmask (!%p242_p9), 1040384  }
   0xf   : > { %844 = vmatpush3.bf16.msra.mxu0 (!%p242_p9), %v938_v0  ;;  %859 = vmatprep.mubr.msk.bf16.mxu0 (!%p242_p9), %vm1021_vm0, %v1020_v1  ;;  %v944_v7 = vld [vmem:[%s1260_s1 + $0x30] sm:$0xff] (!%p242_p9)   ;;  %v945_v8 = vld [vmem:[%s1260_s1 + $0x38] sm:$0xff] (!%p242_p9)   ;;  %v779_v12 = vld [vmem:[%s1261_s2] ss:$0 sm:$0xff] (!%p242_p9)  ;;  %vm416_vm2 = vcmask (!%p242_p9), 1046528   ;;  %vm442_vm3 = vcmask (!%p242_p9), 261120  }
  0x10   : > { %845 = vmatprep.subr.bf16.mxu0 (!%p242_p9), %v1020_v1  ;;  %867 = vmatprep.mubr.msk.bf16.mxu1 (!%p242_p9), %vm1021_vm0, %v1020_v1  ;;  %v947_v10 = vld [vmem:[%s1262_s3 + $0x10] sm:$0xff] (!%p242_p9)   ;;  %v948_v11 = vld [vmem:[%s1262_s3 + $0x18] sm:$0xff] (!%p242_p9)   ;;  %v949_v25 = vld [vmem:[%s1262_s3] sm:$0xff] (!%p242_p9)   ;;  %s816_s16 = sshll.u32 (!%p242_p9), %s1086_s28, 7  ;;  %s1022_s28 = smov (!%p242_p9), [#allocation2]  }
  0x11   : > { %864 = vmatpush3.bf16.msra.mxu1 (!%p242_p9), %v947_v10  ;;  %v950_v33 = vld [vmem:[%s1262_s3 + $0x8] sm:$0xff] (!%p242_p9)   ;;  %v951_v34 = vld [vmem:[%s1262_s3 + $0x20] sm:$0xff] (!%p242_p9)   ;;  %s1214_s21 = scalar_lea.hbm (!%p242_p9), %s1266_s7, %s816_s16  ;;  %s960_s29 = sshll.u32 (!%p242_p9), %s1022_s28, 4  ;;  %s961_s29 = int_to_ptr.vmem [resolvable:$false] %s960_s29 }
  0x12   : > { %865 = vmatprep.subr.bf16.mxu1 (!%p242_p9), %v1020_v1  ;;  %v952_v35 = vld [vmem:[%s1262_s3 + $0x28] sm:$0xff] (!%p242_p9)   ;;  %v953_v36 = vld [vmem:[%s1264_s5] sm:$0xff] (!%p242_p9)   ;;  %s962_s8 = scalar_lea.vmem (!%p242_p9), %s961_s29, 256 }
  0x13   : > { %846 = vmatpush3.bf16.msra.mxu0 (!%p242_p9), %v939_v2  ;;  %v954_v37 = vld [vmem:[%s1264_s5 + $0x8] sm:$0xff] (!%p242_p9)   ;;  %v806_v49 = vld [vmem:[%s1263_s4] ss:$0 sm:$0xff] (!%p242_p9) }
  0x14   : > { %847 = vmatprep.subr.bf16.mxu0 (!%p242_p9), %v1020_v1  ;;  %v807_v60 = vld [vmem:[%s1265_s6] ss:$0 sm:$0xff] (!%p242_p9) }
  0x15   : > { %s1274_s19 = smov (!%p274_p10, %s777_s19), 3  ;;  %866 = vmatpush3.bf16.msra.mxu1 %v948_v11 }
  0x16   : > { %s778_s9 = sshll.u32 %s1274_s19, 2  ;;  %871 = vmatprep.subr.bf16.mxu1 %v1020_v1 }
  0x17   : > { %848 = vmatpush3.bf16.msra.mxu0 %v940_v3  ;;  %s277_s17 = scalar_lea.vmem %s1259_s0, %s778_s9  ;;  %s270_s9 = sand.u32 1, %s1010_s25  }
  0x18   : > { %849 = vmatprep.subr.bf16.mxu0 %v1020_v1  ;;  %v1153_v9 = vld [vmem:[%s277_s17] sm:$0xff]   ;;  %s776_s15 = sshll.u32 %s270_s9, 3  ;;  %s1218_s22 = scalar_lea.sflag [#allocation3], %s270_s9 }
  0x19   : > { %v686_v61 = vunpack.c.l.bf16 %v1153_v9  ;;  %s272_s17 = scalar_lea.vmem [#allocation2], %s776_s15 }
  0x1a   : > { %s710_s18 = sshll.u32 %s272_s17, 4  ;;  %s1216_s18 = int_to_ptr.vmem [resolvable:$true] %s710_s18 }
  0x1b   : > { %850 = vmatpush3.bf16.msra.mxu0 %v941_v4  ;;  %s956_s23 = scalar_lea.vmem %s1216_s18, 128  ;;  %p963_p0 = scmp.lt.s32.totalorder %s1216_s18, %s961_s29 }
  0x1c   : > { %851 = vmatprep.subr.bf16.mxu0 %v1020_v1  ;;  %p957_p11 = scmp.ne.s32.totalorder %s1216_s18, %s956_s23  ;;  %p964_p1 = scmp.lt.s32.totalorder %s962_s8, %s956_s23 }
  0x1e   : > { %p958_p12 = pnand %p957_p11, %p1103_p5  ;;  %p965_p2 = por %p964_p1, %p963_p0 }
  0x1f   : > { %852 = vmatpush3.bf16.msra.mxu0 %v942_v5 }
  0x20   : > { %853 = vmatprep.subr.bf16.mxu0 %v1020_v1  ;;  %p959_p13 = pneg %p958_p12 }
  0x22   : > { %p966_p3 = pnand %p965_p2, %p959_p13 }
  0x23   : > { %854 = vmatpush3.bf16.msra.mxu0 %v943_v6 }
  0x24   : > { %855 = vmatprep.subr.bf16.mxu0 %v1020_v1 }
  0x27   : > { %856 = vmatpush3.bf16.msra.mxu0 %v944_v7 }
  0x28   : > { %857 = vmatprep.subr.bf16.mxu0 %v1020_v1 }
  0x2b   : > { %858 = vmatpush3.bf16.msra.mxu0 %v945_v8 }
  0x2e   : > { %860 = vmatmul.mubr.bf16.vlgmr.msra.gmra.mrb[0].mxu0 %v1153_v9 }
 0x101   : > { %v394_v13 = vpop.f32.mrb[0].mxu0 }
 0x102   : > { %v395_v14 = vadd.f32 %v779_v12, %v394_v13  ;;  %v861_v15 = vpop.f32.mrb[1].mxu0 }
 0x103   : > { %v397_v16 = vpop.f32.mrb[2].mxu0 }
 0x104   : > { %v401_v17 = vmax.f32 %v395_v14, 0.0  ;;  %v398_v18 = vadd.f32 %v779_v12, %v397_v16  ;;  %v862_v19 = vpop.f32.mrb[3].mxu0 }
 0x106   : > { %v405_v20 = vrot.slane %v401_v17, 7  ;;  %v412_v21 = vrot.slane %v401_v17, 1  ;;  %v402_v22 = vmax.f32 %v398_v18, 0.0 }
 0x108   : > { %v406_v23 = vrot.slane %v402_v22, 7  ;;  %v413_v24 = vrot.slane %v402_v22, 1  ;;  %v424_v26 = vpack.c.bf16 %v402_v22, %v401_v17  ;;  %v410_v27 = vsel %vm409_vm1, 0.0, %v405_v20 }
 0x109   : > { %v417_v28 = vsel %vm416_vm2, %v412_v21, 0.0 }
 0x10a   : > { %v411_v29 = vsel %vm409_vm1, 0.0, %v406_v23  ;;  %v418_v30 = vsel %vm416_vm2, %v413_v24, 0.0  ;;  %868 = vmatmul.mubr.msk.bf16.vlgmr.msra.gmra.mrb[0].mxu1 %vm442_vm3, %v424_v26 }
 0x10b   : > { %v419_v31 = vpack.c.bf16 %v411_v29, %v410_v27  ;;  %v543_v32 = vpack.c.bf16 %v418_v30, %v417_v28  ;;  %872 = vmatpush3.bf16.msra.mxu1 %v949_v25  ;;  %875 = vmatprep.mubr.msk.bf16.mxu1 %vm1021_vm0, %v1020_v1 }
 0x10c   : > { %873 = vmatprep.subr.bf16.mxu1 %v1020_v1 }
 0x10f   : > { %874 = vmatpush3.bf16.msra.mxu1 %v950_v33 }
 0x110   : > { %879 = vmatprep.subr.bf16.mxu1 %v1020_v1 }
 0x112   : > { %876 = vmatmul.mubr.msk.bf16.vlgmr.msra.gmra.mrb[4].mxu1 %vm442_vm3, %v419_v31 }
 0x113   : > { %880 = vmatpush3.bf16.msra.mxu1 %v951_v34  ;;  %883 = vmatprep.mubr.msk.bf16.mxu1 %vm1021_vm0, %v1020_v1 }
 0x114   : > { %881 = vmatprep.subr.bf16.mxu1 %v1020_v1 }
 0x117   : > { %882 = vmatpush3.bf16.msra.mxu1 %v952_v35 }
 0x118   : > { %887 = vmatprep.subr.bf16.mxu1 %v1020_v1 }
 0x11a   : > { %884 = vmatmul.mubr.msk.bf16.vlgmr.msra.gmra.mrb[8].mxu1 %vm442_vm3, %v543_v32 }
 0x11b   : > { %891 = vmatprep.mubr.msk.bf16.mxu1 %vm1021_vm0, %v1020_v1  ;;  %888 = vmatpush3.bf16.msra.mxu1 %v953_v36 }
 0x11c   : > { %889 = vmatprep.subr.bf16.mxu1 %v1020_v1  ;;  %v687_v1 = vunpack.c.h.bf16 %v1153_v9 }
 0x11f   : > { %890 = vmatpush3.bf16.msra.mxu1 %v954_v37 }
 0x1dd   : > { %v480_v38 = vpop.f32.mrb[0].mxu1 }
 0x1de   : > { %v869_v39 = vpop.f32.mrb[1].mxu1 }
 0x1df   : > { %v483_v40 = vpop.f32.mrb[2].mxu1 }
 0x1e0   : > { %v870_v41 = vpop.f32.mrb[3].mxu1 }
 0x1e5   : > { %v536_v42 = vpop.f32.mrb[4].mxu1 }
 0x1e6   : > { %v537_v43 = vadd.f32 %v536_v42, %v480_v38  ;;  %v877_v44 = vpop.f32.mrb[5].mxu1 }
 0x1e7   : > { %v539_v45 = vpop.f32.mrb[6].mxu1 }
 0x1e8   : > { %v540_v46 = vadd.f32 %v539_v45, %v483_v40  ;;  %v878_v47 = vpop.f32.mrb[7].mxu1 }
 0x1ed   : > { %v598_v48 = vpop.f32.mrb[8].mxu1 }
 0x1ee   : > { %v605_v50 = vadd.f32 %v598_v48, %v537_v43  ;;  %v885_v51 = vpop.f32.mrb[9].mxu1 }
 0x1ef   : > { %v601_v52 = vpop.f32.mrb[10].mxu1 }
 0x1f0   : > { %v614_v53 = vadd.f32 %v806_v49, %v605_v50  ;;  %v606_v54 = vadd.f32 %v601_v52, %v540_v46  ;;  %v886_v55 = vpop.f32.mrb[11].mxu1 }
 0x1f2   : > { %v615_v56 = vadd.f32 %v806_v49, %v606_v54  ;;  %v616_v57 = vmax.f32 %v614_v53, 0.0 }
 0x1f4   : > { %v617_v58 = vmax.f32 %v615_v56, 0.0 }
 0x1f6   : > { %v618_v59 = vpack.c.bf16 %v617_v58, %v616_v57 }
 0x1f8   : > { %892 = vmatmul.mubr.msk.bf16.vlgmr.msra.gmra.mrb[12].mxu1 %vm442_vm3, %v618_v59 }
 0x2cb   : > { %v679_v62 = vpop.f32.mrb[12].mxu1 }
 0x2cc   : > { %v680_v63 = vadd.f32 %v807_v60, %v679_v62  ;;  %v893_v0 = vpop.f32.mrb[13].mxu1 }
 0x2cd   : > { %v682_v2 = vpop.f32.mrb[14].mxu1 }
 0x2ce   : > { %v688_v3 = vadd.f32 %v686_v61, %v680_v63  ;;  %v683_v4 = vadd.f32 %v807_v60, %v682_v2  ;;  %v894_v5 = vpop.f32.mrb[15].mxu1 }
 0x2d0   : > { %v689_v6 = vadd.f32 %v687_v1, %v683_v4  ;;  %v690_v7 = vmax.f32 %v688_v3, 0.0 }
 0x2d2   : > { %v691_v8 = vmax.f32 %v689_v6, 0.0 }
 0x2d4   : > { %v820_v9 = vpack.c.bf16 %v691_v8, %v690_v7 }
 0x2d6   : > { %821 = vst [vmem:[%s272_s17] sm:$0xff] %v820_v9  }
 0x2d7   : > { %969 = shalt.err (!%p966_p3)
}
 0x2d8   : > { %s970_s9 = scalar_lea.hbm %s1214_s21, 128  ;;  %s974_s15 = scalar_lea.hbm %s1266_s7, 256 }
 0x2d9   : > { %p971_p4 = scmp.ne.s32.totalorder %s1214_s21, %s970_s9  ;;  %p975_p9 = scmp.lt.u32.totalorder %s1214_s21, %s1266_s7 }
 0x2da   : > { %p976_p10 = scmp.lt.u32.totalorder %s974_s15, %s970_s9  ;;  %p978_p12 = scmp.lt.u32.totalorder %s970_s9, %s1214_s21 }
 0x2db   : > { %p972_p7 = pnand %p971_p4, %p1103_p5 }
 0x2dc   : > { %p977_p11 = por %p976_p10, %p975_p9 }
 0x2dd   : > { %p973_p8 = pneg %p972_p7 }
 0x2de   : > { %p979_p13 = por %p978_p12, %p977_p11 }
 0x2e0   : > { %p980_p0 = pnand %p979_p13, %p973_p8 }
 0x2e2   : > { %983 = shalt.err (!%p980_p0)
}
 0x2e3   : > { %s1023_s20 = smov 64   ;;  %s1024_s19 = smov 4  }
 0x2e4   : > { %895 = dma.vmem_to_hbm [thread:$0]  (%p1103_p5), %s1216_s18, 128, %s1214_s21, %s1218_s22, %s1023_s20, %s1023_s20, %s1024_s19  }
 0x2e5 PF: > { %p901_p1 = scmp.ge.s32.totalorder %s1018_s27, 2  ;;  %s725_s23 = sand.u32 1, %s1006_s24  }
 0x2e6   : > { %s726_s28 = scalar_lea.sflag [#allocation3], %s725_s23 }
 0x2e7   : > { %p898_p2 = pnand %p901_p1, %p1107_p6 }
 0x2e9   : > { %1001 = dma.done.wait (!%p898_p2), %s726_s28, 128  }
 0x2ea   : > { %1003 = vsyncadd (!%p898_p2), %s726_s28, 4294967168  ;;  %p17_p3 = scmp.ge.s32.totalorder %s1090_s30, 4   ;;  %s1269_s24 = smov %s1010_s25 }
 0x2eb   : > { %s1270_s25 = smov %s1014_s26  ;;  %s1271_s26 = smov %s1101_s10 }
 0x2ec   : > { %s1272_s27 = smov %s1090_s30  ;;  %19 = sbr.rel (!%p17_p3) target bundleno = 3 (0x3), region = 85 }
 0x2f3   :  { %731 = vsyncpa [#allocation3], 1 }
 0x2f4   :  { %733 = vsyncpa [#allocation3 + $0x1], 1 }

// kernel: tpu_custom_call.1
= control target key start
LH: loop header
LB: loop body
LE: loop exit
PB: predicated region body
PF: predicated region fallthrough
CT: control target
= control target key end

     0   :  { %12 = vsyncpa [#allocation3], 0  ;;  %s1259_s0 = inlined_call_operand.vmem [shape: bf16[4,8,128], index: 0, kind: input, shape index: {}]   ;;  %s1260_s1 = inlined_call_operand.vmem [shape: bf16[128,32], index: 1, kind: input, shape index: {}]   ;;  %s1261_s2 = inlined_call_operand.vmem [shape: f32[1,32], index: 2, kind: input, shape index: {}]   ;;  %s1262_s3 = inlined_call_operand.vmem [shape: bf16[3,32,32], index: 3, kind: input, shape index: {}]   ;;  %s1263_s4 = inlined_call_operand.vmem [shape: f32[1,32], index: 4, kind: input, shape index: {}]   ;;  %s1264_s5 = inlined_call_operand.vmem [shape: bf16[32,128], index: 5, kind: input, shape index: {}]   ;;  %s1265_s6 = inlined_call_operand.vmem [shape: f32[1,128], index: 6, kind: input, shape index: {}]   ;;  %s1266_s7 = inlined_call_operand.hbm [shape: bf16[4,8,128], index: 7, kind: output, shape index: {}]  }
   0x1   :  { %14 = vsyncpa [#allocation3 + $0x1], 0  ;;  %s1065_s24 = smov 0   ;;  %s1067_s25 = smov 0  }
   0x2   :  { %s1069_s26 = smov 0   ;;  %s1071_s27 = smov 0  }
   0x3 LB: > { %s1086_s28 = sadd.s32 4294967295, %s1018_s27   ;;  %s772_s29 = sadd.s32 4294967294, %s1018_s27   ;;  %s1018_s27 = sphi %s1071_s27, %s1272_s27   ;;  %s1014_s26 = sphi %s1069_s26, %s1271_s26   ;;  %s1010_s25 = sphi %s1067_s25, %s1270_s25   ;;  %s1006_s24 = sphi %s1065_s24, %s1269_s24  }
   0x4   : > { %s1090_s30 = sadd.s32 1, %s1018_s27   ;;  %s179_s8 = sadd.s32 1, %s1014_s26 }
   0x5   : > { %s176_s9 = ssub.s32 %s1018_s27, %s1090_s30  ;;  %p189_p0 = scmp.ne.s32.totalorder %s1014_s26, %s1010_s25 }
   0x6   : > { %p177_p1 = scmp.eq.s32.totalorder %s176_s9, 0  ;;  %p190_p2 = scmp.eq.s32.totalorder %s1086_s28, 1 }
   0x7   : > { %p195_p3 = scmp.ne.s32.totalorder %s1010_s25, %s1006_s24  ;;  %p196_p4 = scmp.eq.s32.totalorder %s772_s29, 1 }
   0x8   : > { %s1101_s10 = scalar_select %p177_p1, %s1014_s26, %s179_s8  }
   0x9   : > { %p1103_p5 = por %p190_p2, %p189_p0  ;;  %p1107_p6 = por %p196_p4, %p195_p3 }
   0xa   : > { %p775_p7 = scmp.ge.s32.totalorder %s1018_s27, 1  ;;  %p241_p8 = scmp.lt.s32.totalorder %s1018_s27, 3 }
   0xc   : > { %p242_p9 = pnand %p775_p7, %p241_p8 }
   0xd   : > { %v938_v0 = vld [vmem:[%s1260_s1] sm:$0xff] (!%p242_p9)   ;;  %v1020_v1 = vmov (!%p242_p9), 0.0   ;;  %v939_v2 = vld [vmem:[%s1260_s1 + $0x8] sm:$0xff] (!%p242_p9)   ;;  %vm1021_vm0 = vmmov (!%p242_p9), 0   ;;  %v940_v3 = vld [vmem:[%s1260_s1 + $0x10] sm:$0xff] (!%p242_p9)   ;;  %s777_s19 = sshll.u32 (!%p242_p9), %s1086_s28, 1 }
   0xe   : > { %245 = sbr.rel (%p242_p9) target bundleno = 741 (0x2e5), region = 48  ;;  %843 = vmatprep.subr.bf16.mxu0 (!%p242_p9), %v1020_v1  ;;  %863 = vmatprep.subr.bf16.mxu1 (!%p242_p9), %v1020_v1  ;;  %v941_v4 = vld [vmem:[%s1260_s1 + $0x18] sm:$0xff] (!%p242_p9)   ;;  %p274_p10 = scmp.lt.s32.totalorder (!%p242_p9), %s777_s19, 3  ;;  %v942_v5 = vld [vmem:[%s1260_s1 + $0x20] sm:$0xff] (!%p242_p9)   ;;  %v943_v6 = vld [vmem:[%s1260_s1 + $0x28] sm:$0xff] (!%p242_p9)   ;;  %vm409_vm1 = vcmask (!%p242_p9), 1040384  }
   0xf   : > { %844 = vmatpush3.bf16.msra.mxu0 (!%p242_p9), %v938_v0  ;;  %859 = vmatprep.mubr.msk.bf16.mxu0 (!%p242_p9), %vm1021_vm0, %v1020_v1  ;;  %v944_v7 = vld [vmem:[%s1260_s1 + $0x30] sm:$0xff] (!%p242_p9)   ;;  %v945_v8 = vld [vmem:[%s1260_s1 + $0x38] sm:$0xff] (!%p242_p9)   ;;  %v779_v12 = vld [vmem:[%s1261_s2] ss:$0 sm:$0xff] (!%p242_p9)  ;;  %vm416_vm2 = vcmask (!%p242_p9), 1046528   ;;  %vm442_vm3 = vcmask (!%p242_p9), 261120  }
  0x10   : > { %845 = vmatprep.subr.bf16.mxu0 (!%p242_p9), %v1020_v1  ;;  %867 = vmatprep.mubr.msk.bf16.mxu1 (!%p242_p9), %vm1021_vm0, %v1020_v1  ;;  %v947_v10 = vld [vmem:[%s1262_s3 + $0x10] sm:$0xff] (!%p242_p9)   ;;  %v948_v11 = vld [vmem:[%s1262_s3 + $0x18] sm:$0xff] (!%p242_p9)   ;;  %v949_v25 = vld [vmem:[%s1262_s3] sm:$0xff] (!%p242_p9)   ;;  %s816_s16 = sshll.u32 (!%p242_p9), %s1086_s28, 7  ;;  %s1022_s28 = smov (!%p242_p9), [#allocation2]  }
  0x11   : > { %864 = vmatpush3.bf16.msra.mxu1 (!%p242_p9), %v947_v10  ;;  %v950_v33 = vld [vmem:[%s1262_s3 + $0x8] sm:$0xff] (!%p242_p9)   ;;  %v951_v34 = vld [vmem:[%s1262_s3 + $0x20] sm:$0xff] (!%p242_p9)   ;;  %s1214_s21 = scalar_lea.hbm (!%p242_p9), %s1266_s7, %s816_s16  ;;  %s960_s29 = sshll.u32 (!%p242_p9), %s1022_s28, 4  ;;  %s961_s29 = int_to_ptr.vmem [resolvable:$false] %s960_s29 }
  0x12   : > { %865 = vmatprep.subr.bf16.mxu1 (!%p242_p9), %v1020_v1  ;;  %v952_v35 = vld [vmem:[%s1262_s3 + $0x28] sm:$0xff] (!%p242_p9)   ;;  %v953_v36 = vld [vmem:[%s1264_s5] sm:$0xff] (!%p242_p9)   ;;  %s962_s8 = scalar_lea.vmem (!%p242_p9), %s961_s29, 256 }
  0x13   : > { %846 = vmatpush3.bf16.msra.mxu0 (!%p242_p9), %v939_v2  ;;  %v954_v37 = vld [vmem:[%s1264_s5 + $0x8] sm:$0xff] (!%p242_p9)   ;;  %v806_v49 = vld [vmem:[%s1263_s4] ss:$0 sm:$0xff] (!%p242_p9) }
  0x14   : > { %847 = vmatprep.subr.bf16.mxu0 (!%p242_p9), %v1020_v1  ;;  %v807_v60 = vld [vmem:[%s1265_s6] ss:$0 sm:$0xff] (!%p242_p9) }
  0x15   : > { %s1274_s19 = smov (!%p274_p10, %s777_s19), 3  ;;  %866 = vmatpush3.bf16.msra.mxu1 %v948_v11 }
  0x16   : > { %s778_s9 = sshll.u32 %s1274_s19, 2  ;;  %871 = vmatprep.subr.bf16.mxu1 %v1020_v1 }
  0x17   : > { %848 = vmatpush3.bf16.msra.mxu0 %v940_v3  ;;  %s277_s17 = scalar_lea.vmem %s1259_s0, %s778_s9  ;;  %s270_s9 = sand.u32 1, %s1010_s25  }
  0x18   : > { %849 = vmatprep.subr.bf16.mxu0 %v1020_v1  ;;  %v1153_v9 = vld [vmem:[%s277_s17] sm:$0xff]   ;;  %s776_s15 = sshll.u32 %s270_s9, 3  ;;  %s1218_s22 = scalar_lea.sflag [#allocation3], %s270_s9 }
  0x19   : > { %v686_v61 = vunpack.c.l.bf16 %v1153_v9  ;;  %s272_s17 = scalar_lea.vmem [#allocation2], %s776_s15 }
  0x1a   : > { %s710_s18 = sshll.u32 %s272_s17, 4  ;;  %s1216_s18 = int_to_ptr.vmem [resolvable:$true] %s710_s18 }
  0x1b   : > { %850 = vmatpush3.bf16.msra.mxu0 %v941_v4  ;;  %s956_s23 = scalar_lea.vmem %s1216_s18, 128  ;;  %p963_p0 = scmp.lt.s32.totalorder %s1216_s18, %s961_s29 }
  0x1c   : > { %851 = vmatprep.subr.bf16.mxu0 %v1020_v1  ;;  %p957_p11 = scmp.ne.s32.totalorder %s1216_s18, %s956_s23  ;;  %p964_p1 = scmp.lt.s32.totalorder %s962_s8, %s956_s23 }
  0x1e   : > { %p958_p12 = pnand %p957_p11, %p1103_p5  ;;  %p965_p2 = por %p964_p1, %p963_p0 }
  0x1f   : > { %852 = vmatpush3.bf16.msra.mxu0 %v942_v5 }
  0x20   : > { %853 = vmatprep.subr.bf16.mxu0 %v1020_v1  ;;  %p959_p13 = pneg %p958_p12 }
  0x22   : > { %p966_p3 = pnand %p965_p2, %p959_p13 }
  0x23   : > { %854 = vmatpush3.bf16.msra.mxu0 %v943_v6 }
  0x24   : > { %855 = vmatprep.subr.bf16.mxu0 %v1020_v1 }
  0x27   : > { %856 = vmatpush3.bf16.msra.mxu0 %v944_v7 }
  0x28   : > { %857 = vmatprep.subr.bf16.mxu0 %v1020_v1 }
  0x2b   : > { %858 = vmatpush3.bf16.msra.mxu0 %v945_v8 }
  0x2e   : > { %860 = vmatmul.mubr.bf16.vlgmr.msra.gmra.mrb[0].mxu0 %v1153_v9 }
 0x101   : > { %v394_v13 = vpop.f32.mrb[0].mxu0 }
 0x102   : > { %v395_v14 = vadd.f32 %v779_v12, %v394_v13  ;;  %v861_v15 = vpop.f32.mrb[1].mxu0 }
 0x103   : > { %v397_v16 = vpop.f32.mrb[2].mxu0 }
 0x104   : > { %v401_v17 = vmax.f32 %v395_v14, 0.0  ;;  %v398_v18 = vadd.f32 %v779_v12, %v397_v16  ;;  %v862_v19 = vpop.f32.mrb[3].mxu0 }
 0x106   : > { %v405_v20 = vrot.slane %v401_v17, 7  ;;  %v412_v21 = vrot.slane %v401_v17, 1  ;;  %v402_v22 = vmax.f32 %v398_v18, 0.0 }
 0x108   : > { %v406_v23 = vrot.slane %v402_v22, 7  ;;  %v413_v24 = vrot.slane %v402_v22, 1  ;;  %v424_v26 = vpack.c.bf16 %v402_v22, %v401_v17  ;;  %v410_v27 = vsel %vm409_vm1, 0.0, %v405_v20 }
 0x109   : > { %v417_v28 = vsel %vm416_vm2, %v412_v21, 0.0 }
 0x10a   : > { %v411_v29 = vsel %vm409_vm1, 0.0, %v406_v23  ;;  %v418_v30 = vsel %vm416_vm2, %v413_v24, 0.0  ;;  %868 = vmatmul.mubr.msk.bf16.vlgmr.msra.gmra.mrb[0].mxu1 %vm442_vm3, %v424_v26 }
 0x10b   : > { %v419_v31 = vpack.c.bf16 %v411_v29, %v410_v27  ;;  %v543_v32 = vpack.c.bf16 %v418_v30, %v417_v28  ;;  %872 = vmatpush3.bf16.msra.mxu1 %v949_v25  ;;  %875 = vmatprep.mubr.msk.bf16.mxu1 %vm1021_vm0, %v1020_v1 }
 0x10c   : > { %873 = vmatprep.subr.bf16.mxu1 %v1020_v1 }
 0x10f   : > { %874 = vmatpush3.bf16.msra.mxu1 %v950_v33 }
 0x110   : > { %879 = vmatprep.subr.bf16.mxu1 %v1020_v1 }
 0x112   : > { %876 = vmatmul.mubr.msk.bf16.vlgmr.msra.gmra.mrb[4].mxu1 %vm442_vm3, %v419_v31 }
 0x113   : > { %880 = vmatpush3.bf16.msra.mxu1 %v951_v34  ;;  %883 = vmatprep.mubr.msk.bf16.mxu1 %vm1021_vm0, %v1020_v1 }
 0x114   : > { %881 = vmatprep.subr.bf16.mxu1 %v1020_v1 }
 0x117   : > { %882 = vmatpush3.bf16.msra.mxu1 %v952_v35 }
 0x118   : > { %887 = vmatprep.subr.bf16.mxu1 %v1020_v1 }
 0x11a   : > { %884 = vmatmul.mubr.msk.bf16.vlgmr.msra.gmra.mrb[8].mxu1 %vm442_vm3, %v543_v32 }
 0x11b   : > { %891 = vmatprep.mubr.msk.bf16.mxu1 %vm1021_vm0, %v1020_v1  ;;  %888 = vmatpush3.bf16.msra.mxu1 %v953_v36 }
 0x11c   : > { %889 = vmatprep.subr.bf16.mxu1 %v1020_v1  ;;  %v687_v1 = vunpack.c.h.bf16 %v1153_v9 }
 0x11f   : > { %890 = vmatpush3.bf16.msra.mxu1 %v954_v37 }
 0x1dd   : > { %v480_v38 = vpop.f32.mrb[0].mxu1 }
 0x1de   : > { %v869_v39 = vpop.f32.mrb[1].mxu1 }
 0x1df   : > { %v483_v40 = vpop.f32.mrb[2].mxu1 }
 0x1e0   : > { %v870_v41 = vpop.f32.mrb[3].mxu1 }
 0x1e5   : > { %v536_v42 = vpop.f32.mrb[4].mxu1 }
 0x1e6   : > { %v537_v43 = vadd.f32 %v536_v42, %v480_v38  ;;  %v877_v44 = vpop.f32.mrb[5].mxu1 }
 0x1e7   : > { %v539_v45 = vpop.f32.mrb[6].mxu1 }
 0x1e8   : > { %v540_v46 = vadd.f32 %v539_v45, %v483_v40  ;;  %v878_v47 = vpop.f32.mrb[7].mxu1 }
 0x1ed   : > { %v598_v48 = vpop.f32.mrb[8].mxu1 }
 0x1ee   : > { %v605_v50 = vadd.f32 %v598_v48, %v537_v43  ;;  %v885_v51 = vpop.f32.mrb[9].mxu1 }
 0x1ef   : > { %v601_v52 = vpop.f32.mrb[10].mxu1 }
 0x1f0   : > { %v614_v53 = vadd.f32 %v806_v49, %v605_v50  ;;  %v606_v54 = vadd.f32 %v601_v52, %v540_v46  ;;  %v886_v55 = vpop.f32.mrb[11].mxu1 }
 0x1f2   : > { %v615_v56 = vadd.f32 %v806_v49, %v606_v54  ;;  %v616_v57 = vmax.f32 %v614_v53, 0.0 }
 0x1f4   : > { %v617_v58 = vmax.f32 %v615_v56, 0.0 }
 0x1f6   : > { %v618_v59 = vpack.c.bf16 %v617_v58, %v616_v57 }
 0x1f8   : > { %892 = vmatmul.mubr.msk.bf16.vlgmr.msra.gmra.mrb[12].mxu1 %vm442_vm3, %v618_v59 }
 0x2cb   : > { %v679_v62 = vpop.f32.mrb[12].mxu1 }
 0x2cc   : > { %v680_v63 = vadd.f32 %v807_v60, %v679_v62  ;;  %v893_v0 = vpop.f32.mrb[13].mxu1 }
 0x2cd   : > { %v682_v2 = vpop.f32.mrb[14].mxu1 }
 0x2ce   : > { %v688_v3 = vadd.f32 %v686_v61, %v680_v63  ;;  %v683_v4 = vadd.f32 %v807_v60, %v682_v2  ;;  %v894_v5 = vpop.f32.mrb[15].mxu1 }
 0x2d0   : > { %v689_v6 = vadd.f32 %v687_v1, %v683_v4  ;;  %v690_v7 = vmax.f32 %v688_v3, 0.0 }
 0x2d2   : > { %v691_v8 = vmax.f32 %v689_v6, 0.0 }
 0x2d4   : > { %v820_v9 = vpack.c.bf16 %v691_v8, %v690_v7 }
 0x2d6   : > { %821 = vst [vmem:[%s272_s17] sm:$0xff] %v820_v9  }
 0x2d7   : > { %969 = shalt.err (!%p966_p3)
}
 0x2d8   : > { %s970_s9 = scalar_lea.hbm %s1214_s21, 128  ;;  %s974_s15 = scalar_lea.hbm %s1266_s7, 256 }
 0x2d9   : > { %p971_p4 = scmp.ne.s32.totalorder %s1214_s21, %s970_s9  ;;  %p975_p9 = scmp.lt.u32.totalorder %s1214_s21, %s1266_s7 }
 0x2da   : > { %p976_p10 = scmp.lt.u32.totalorder %s974_s15, %s970_s9  ;;  %p978_p12 = scmp.lt.u32.totalorder %s970_s9, %s1214_s21 }
 0x2db   : > { %p972_p7 = pnand %p971_p4, %p1103_p5 }
 0x2dc   : > { %p977_p11 = por %p976_p10, %p975_p9 }
 0x2dd   : > { %p973_p8 = pneg %p972_p7 }
 0x2de   : > { %p979_p13 = por %p978_p12, %p977_p11 }
 0x2e0   : > { %p980_p0 = pnand %p979_p13, %p973_p8 }
 0x2e2   : > { %983 = shalt.err (!%p980_p0)
}
 0x2e3   : > { %s1023_s20 = smov 64   ;;  %s1024_s19 = smov 4  }
 0x2e4   : > { %895 = dma.vmem_to_hbm [thread:$0]  (%p1103_p5), %s1216_s18, 128, %s1214_s21, %s1218_s22, %s1023_s20, %s1023_s20, %s1024_s19  }
 0x2e5 PF: > { %p901_p1 = scmp.ge.s32.totalorder %s1018_s27, 2  ;;  %s725_s23 = sand.u32 1, %s1006_s24  }
 0x2e6   : > { %s726_s28 = scalar_lea.sflag [#allocation3], %s725_s23 }
 0x2e7   : > { %p898_p2 = pnand %p901_p1, %p1107_p6 }
 0x2e9   : > { %1001 = dma.done.wait (!%p898_p2), %s726_s28, 128  }
 0x2ea   : > { %1003 = vsyncadd (!%p898_p2), %s726_s28, 4294967168  ;;  %p17_p3 = scmp.ge.s32.totalorder %s1090_s30, 4   ;;  %s1269_s24 = smov %s1010_s25 }
 0x2eb   : > { %s1270_s25 = smov %s1014_s26  ;;  %s1271_s26 = smov %s1101_s10 }
 0x2ec   : > { %s1272_s27 = smov %s1090_s30  ;;  %19 = sbr.rel (!%p17_p3) target bundleno = 3 (0x3), region = 85 }
 0x2f3   :  { %731 = vsyncpa [#allocation3], 1 }
 0x2f4   :  { %733 = vsyncpa [#allocation3 + $0x1], 1 }

</bundles_post_ra>
